<compile_context>
chip_gen: v5e
topology: v5e:2x2
jax: 0.10.0
libtpu: 0.0.40
codegen_flags: <defaults>
</compile_context>

<pallas_src>
import functools

import jax
import jax.numpy as jnp
from jax.experimental import pallas as pl
from jax.experimental.pallas import tpu as pltpu


_VMEM_LIMIT = 48 * 1024 * 1024  # < physical VMEM on v5e/v6e/v7x, > default scoped limits
_LN_EPS = 1e-5


def _gelu(x):
    # TODO(synk): HF Whisper uses exact erf-GELU; tanh approximation used here
    # since erf is not guaranteed to lower in Mosaic.
    c = jnp.float32(0.7978845608028654)  # sqrt(2/pi)
    return 0.5 * x * (1.0 + jnp.tanh(c * (x + 0.044715 * x * x * x)))


# ----------------------------------------------------------------------------
# Fused (optional LayerNorm) + matmul + bias + (optional GELU) + (optional
# residual) kernel, tiled over M and N.
# ----------------------------------------------------------------------------
def _fused_matmul_kernel(x_ref, w_ref, b_ref, *rest, has_ln, has_res, activation):
    refs = list(rest)
    if has_ln:
        g_ref, beta_ref = refs[0], refs[1]
        refs = refs[2:]
    if has_res:
        res_ref = refs[0]
        refs = refs[1:]
    o_ref = refs[0]

    if has_ln:
        xf = x_ref[...].astype(jnp.float32)
        mu = jnp.mean(xf, axis=-1, keepdims=True)
        var = jnp.mean(jnp.square(xf - mu), axis=-1, keepdims=True)
        xf = (xf - mu) * jax.lax.rsqrt(var + _LN_EPS)
        xf = xf * g_ref[...] + beta_ref[...]
        x_mm = xf.astype(w_ref.dtype)
    else:
        x_mm = x_ref[...].astype(w_ref.dtype)

    acc = jnp.dot(x_mm, w_ref[...], preferred_element_type=jnp.float32)
    acc = acc + b_ref[...]
    if activation == "gelu":
        acc = _gelu(acc)
    if has_res:
        acc = acc + res_ref[...].astype(jnp.float32)
    o_ref[...] = acc.astype(o_ref.dtype)


def fused_matmul(x, w, b, *, ln=None, residual=None, activation="none",
                 out_dtype=jnp.bfloat16, tm=256, tn=512):
    """(M,K)@(K,N)+b, optional fused pre-LN / GELU / residual add.

    Tiled over (M, N); K stays resident per block (required for LN fusion).
    """
    M, K = x.shape
    N = w.shape[1]
    tm = M if M <= tm else tm          # (8,128)-aligned tile or full dim
    tn = N if N <= tn else tn
    grid = (pl.cdiv(M, tm), pl.cdiv(N, tn))

    has_ln = ln is not None
    has_res = residual is not None

    in_specs = [
        pl.BlockSpec((tm, K), lambda i, j: (i, 0)),    # activations (resident across j)
        pl.BlockSpec((K, tn), lambda i, j: (0, j)),    # weights
        pl.BlockSpec((1, tn), lambda i, j: (0, j)),    # bias
    ]
    args = [x, w, b.reshape(1, N).astype(jnp.float32)]
    if has_ln:
        g, beta = ln
        in_specs += [pl.BlockSpec((1, K), lambda i, j: (0, 0)),
                     pl.BlockSpec((1, K), lambda i, j: (0, 0))]
        args += [g.reshape(1, K).astype(jnp.float32),
                 beta.reshape(1, K).astype(jnp.float32)]
    if has_res:
        in_specs += [pl.BlockSpec((tm, tn), lambda i, j: (i, j))]
        args += [residual]

    kernel = functools.partial(_fused_matmul_kernel, has_ln=has_ln,
                               has_res=has_res, activation=activation)
    return pl.pallas_call(
        kernel,
        out_shape=jax.ShapeDtypeStruct((M, N), out_dtype),
        grid=grid,
        in_specs=in_specs,
        out_specs=pl.BlockSpec((tm, tn), lambda i, j: (i, j)),
        compiler_params=pltpu.CompilerParams(
            dimension_semantics=("parallel", "parallel"),
            vmem_limit_bytes=_VMEM_LIMIT),
    )(*args)


# ----------------------------------------------------------------------------
# Flash-style self-attention, two heads per grid step (lane-dense I/O).
# q/k/v are read straight out of the fused (B, T, 3D) QKV projection.
# ----------------------------------------------------------------------------
def _flash_attn_kernel(q_ref, k_ref, v_ref, o_ref, m_sc, l_sc, acc_sc,
                       *, dh, scale, seq_len):
    ki = pl.program_id(3)
    nk = pl.num_programs(3)
    tk = k_ref.shape[1]

    @pl.when(ki == 0)
    def _():
        m_sc[...] = jnp.full_like(m_sc, -jnp.inf)
        l_sc[...] = jnp.zeros_like(l_sc)
        acc_sc[...] = jnp.zeros_like(acc_sc)

    q = q_ref[0]        # (tq, 2*dh) bf16
    k = k_ref[0]        # (tk, 2*dh) bf16
    v = v_ref[0]        # (tk, 2*dh) bf16

    need_mask = (seq_len % tk) != 0
    if need_mask:
        kpos = ki * tk + jax.lax.broadcasted_iota(jnp.int32, (1, tk), 1)
        kvalid = kpos < seq_len

    for hh in range(2):                     # two heads packed on the lane axis
        lo = hh * dh
        qh = q[:, lo:lo + dh]
        kh = k[:, lo:lo + dh]
        vh = v[:, lo:lo + dh]
        s = jnp.dot(qh, kh.T, preferred_element_type=jnp.float32) * scale  # (tq, tk)
        if need_mask:
            s = jnp.where(kvalid, s, jnp.float32(-1e30))
        m_prev = m_sc[hh]                                    # (tq, 1)
        m_new = jnp.maximum(m_prev, jnp.max(s, axis=-1, keepdims=True))
        alpha = jnp.exp(m_prev - m_new)
        p = jnp.exp(s - m_new)
        l_sc[hh] = alpha * l_sc[hh] + jnp.sum(p, axis=-1, keepdims=True)
        acc_sc[:, lo:lo + dh] = alpha * acc_sc[:, lo:lo + dh] + jnp.dot(
            p.astype(vh.dtype), vh, preferred_element_type=jnp.float32)
        m_sc[hh] = m_new

    @pl.when(ki == nk - 1)
    def _():
        acc_sc[:, :dh] = acc_sc[:, :dh] * pl.reciprocal(l_sc[0], approx=True)
        acc_sc[:, dh:] = acc_sc[:, dh:] * pl.reciprocal(l_sc[1], approx=True)
        o_ref[0] = acc_sc[...].astype(o_ref.dtype)


def flash_attention(qkv, n_heads, scale, *, tq=256, tk=512, out_dtype=jnp.bfloat16):
    """qkv: (B, T, 3*D) (q|k|v concatenated). Returns (B, T, D)."""
    B, T, threeD = qkv.shape
    D = threeD // 3
    dh = D // n_heads
    assert n_heads % 2 == 0, "kernel processes two heads per step"
    hw = 2 * dh                         # lanes per head-pair (128 for real Whisper)
    nhp = n_heads // 2
    tq = T if T <= tq else tq
    tk = T if T <= tk else tk
    grid = (B, nhp, pl.cdiv(T, tq), pl.cdiv(T, tk))

    q_spec = pl.BlockSpec((1, tq, hw), lambda b, h, qi, ki: (b, qi, h))
    k_spec = pl.BlockSpec((1, tk, hw), lambda b, h, qi, ki: (b, ki, nhp + h))
    v_spec = pl.BlockSpec((1, tk, hw), lambda b, h, qi, ki: (b, ki, 2 * nhp + h))
    o_spec = pl.BlockSpec((1, tq, hw), lambda b, h, qi, ki: (b, qi, h))

    kernel = functools.partial(_flash_attn_kernel, dh=dh, scale=scale, seq_len=T)
    return pl.pallas_call(
        kernel,
        out_shape=jax.ShapeDtypeStruct((B, T, D), out_dtype),
        grid=grid,
        in_specs=[q_spec, k_spec, v_spec],
        out_specs=o_spec,
        scratch_shapes=[pltpu.VMEM((2, tq, 1), jnp.float32),   # running max (per head)
                        pltpu.VMEM((2, tq, 1), jnp.float32),   # running denom
                        pltpu.VMEM((tq, hw), jnp.float32)],    # output accumulator
        compiler_params=pltpu.CompilerParams(
            dimension_semantics=("parallel", "parallel", "parallel", "arbitrary"),
            vmem_limit_bytes=_VMEM_LIMIT),
    )(qkv, qkv, qkv)


# ----------------------------------------------------------------------------
# Conv1d (k=3, pad=1) kernels: shifted-matmul accumulate, no im2col.
# ----------------------------------------------------------------------------
def _conv3_s1_gelu_kernel(x_ref, w_ref, b_ref, o_ref):
    t_out = o_ref.shape[1]
    acc = jnp.dot(x_ref[0, pl.ds(0, t_out), :], w_ref[0],
                  preferred_element_type=jnp.float32)
    acc = acc + jnp.dot(x_ref[0, pl.ds(1, t_out), :], w_ref[1],
                        preferred_element_type=jnp.float32)
    acc = acc + jnp.dot(x_ref[0, pl.ds(2, t_out), :], w_ref[2],
                        preferred_element_type=jnp.float32)
    acc = acc + b_ref[...]
    o_ref[0] = _gelu(acc).astype(o_ref.dtype)


def conv1d_k3_s1_gelu(x, w, b, out_dtype=jnp.bfloat16):
    """x: (B, T, C_in) channel-last; w: (3, C_in, C_out). Returns (B, T, C_out)."""
    B, T, C_in = x.shape
    C_out = w.shape[-1]
    xp = jnp.pad(x, ((0, 0), (1, 1), (0, 0)))
    # TODO(synk): for very long inputs the time axis could also be tiled.
    return pl.pallas_call(
        _conv3_s1_gelu_kernel,
        out_shape=jax.ShapeDtypeStruct((B, T, C_out), out_dtype),
        grid=(B,),
        in_specs=[pl.BlockSpec((1, T + 2, C_in), lambda bb: (bb, 0, 0)),
                  pl.BlockSpec((3, C_in, C_out), lambda bb: (0, 0, 0)),
                  pl.BlockSpec((1, C_out), lambda bb: (0, 0))],
        out_specs=pl.BlockSpec((1, T, C_out), lambda bb: (bb, 0, 0)),
        compiler_params=pltpu.CompilerParams(
            dimension_semantics=("parallel",), vmem_limit_bytes=_VMEM_LIMIT),
    )(xp, w, b.reshape(1, C_out).astype(jnp.float32))


def _conv3_s2_gelu_pos_kernel(xe_ref, xo_ref, w_ref, b_ref, pos_ref, o_ref):
    t_out = o_ref.shape[1]
    acc = jnp.dot(xo_ref[0, pl.ds(0, t_out), :], w_ref[0],       # x[2t-1]
                  preferred_element_type=jnp.float32)
    acc = acc + jnp.dot(xe_ref[0], w_ref[1],                     # x[2t]
                        preferred_element_type=jnp.float32)
    acc = acc + jnp.dot(xo_ref[0, pl.ds(1, t_out), :], w_ref[2], # x[2t+1]
                        preferred_element_type=jnp.float32)
    acc = acc + b_ref[...]
    o_ref[0] = (_gelu(acc) + pos_ref[...]).astype(o_ref.dtype)


def conv1d_k3_s2_gelu_pos(x, w, b, pos, out_dtype=jnp.bfloat16):
    """Stride-2 conv (k=3, pad=1) + GELU with fused positional-embedding add.

    x: (B, T, C) with T even; w: (3, C, C_out); pos: (T//2, C_out).
    Even/odd time split (done once in JAX) turns the strided conv into three
    contiguous-slice matmuls inside the kernel.
    """
    B, T, C = x.shape
    C_out = w.shape[-1]
    T_out = T // 2
    xe = x[:, 0::2, :]                                          # x[2t]
    xo = jnp.pad(x[:, 1::2, :], ((0, 0), (1, 0), (0, 0)))       # row j = x[2j-1], x[-1]=0
    return pl.pallas_call(
        _conv3_s2_gelu_pos_kernel,
        out_shape=jax.ShapeDtypeStruct((B, T_out, C_out), out_dtype),
        grid=(B,),
        in_specs=[pl.BlockSpec((1, T_out, C), lambda bb: (bb, 0, 0)),
                  pl.BlockSpec((1, T_out + 1, C), lambda bb: (bb, 0, 0)),
                  pl.BlockSpec((3, C, C_out), lambda bb: (0, 0, 0)),
                  pl.BlockSpec((1, C_out), lambda bb: (0, 0)),
                  pl.BlockSpec((T_out, C_out), lambda bb: (0, 0))],
        out_specs=pl.BlockSpec((1, T_out, C_out), lambda bb: (bb, 0, 0)),
        compiler_params=pltpu.CompilerParams(
            dimension_semantics=("parallel",), vmem_limit_bytes=_VMEM_LIMIT),
    )(xe, xo, w, b.reshape(1, C_out).astype(jnp.float32), pos)


# ----------------------------------------------------------------------------
# Final LayerNorm (standalone, row-tiled).
# ----------------------------------------------------------------------------
def _layernorm_kernel(x_ref, g_ref, b_ref, o_ref):
    x = x_ref[...].astype(jnp.float32)
    mu = jnp.mean(x, axis=-1, keepdims=True)
    var = jnp.mean(jnp.square(x - mu), axis=-1, keepdims=True)
    y = (x - mu) * jax.lax.rsqrt(var + _LN_EPS)
    o_ref[...] = (y * g_ref[...] + b_ref[...]).astype(o_ref.dtype)


def layernorm(x, g, b, out_dtype=jnp.float32, tm=256):
    M, D = x.shape
    tm = M if M <= tm else tm
    return pl.pallas_call(
        _layernorm_kernel,
        out_shape=jax.ShapeDtypeStruct((M, D), out_dtype),
        grid=(pl.cdiv(M, tm),),
        in_specs=[pl.BlockSpec((tm, D), lambda i: (i, 0)),
                  pl.BlockSpec((1, D), lambda i: (0, 0)),
                  pl.BlockSpec((1, D), lambda i: (0, 0))],
        out_specs=pl.BlockSpec((tm, D), lambda i: (i, 0)),
        compiler_params=pltpu.CompilerParams(
            dimension_semantics=("parallel",), vmem_limit_bytes=_VMEM_LIMIT),
    )(x, g.reshape(1, D).astype(jnp.float32), b.reshape(1, D).astype(jnp.float32))


# ----------------------------------------------------------------------------
# Model glue
# ----------------------------------------------------------------------------
def sinusoids(length, channels, max_timescale=10000.0):
    """Whisper sinusoidal positional embedding, shape (length, channels)."""
    # TODO(synk): pretrained checkpoints store this as embed_positions weights;
    # identical to sinusoids for the stock init but would differ if fine-tuned.
    half = channels // 2
    log_inc = jnp.log(jnp.float32(max_timescale)) / (half - 1)
    inv_timescales = jnp.exp(-log_inc * jnp.arange(half, dtype=jnp.float32))
    scaled_time = jnp.arange(length, dtype=jnp.float32)[:, None] * inv_timescales[None, :]
    return jnp.concatenate([jnp.sin(scaled_time), jnp.cos(scaled_time)], axis=1)


def encoder_layer(p, x, batch, seq):
    """x: (batch*seq, D) bf16 -> (batch*seq, D) bf16."""
    d = x.shape[-1]
    n_heads = p["n_heads"]
    dh = d // n_heads

    # --- self-attention block (pre-LN fused into the QKV projection) ---
    qkv = fused_matmul(x, p["wqkv"], p["bqkv"], ln=(p["ln1_g"], p["ln1_b"]))
    attn = flash_attention(qkv.reshape(batch, seq, 3 * d), n_heads,
                           scale=float(dh) ** -0.5)
    x = fused_matmul(attn.reshape(batch * seq, d), p["wo"], p["bo"], residual=x)

    # --- MLP block (pre-LN fused into fc1, residual fused into fc2) ---
    ff = fused_matmul(x, p["w1"], p["b1"], ln=(p["ln2_g"], p["ln2_b"]),
                      activation="gelu")
    x = fused_matmul(ff, p["w2"], p["b2"], residual=x)
    return x


def whisper_encoder_forward(params, input_features):
    """input_features: (B, n_mels, T) NCL. Returns last_hidden_state (B, T//2, d_model)."""
    B, n_mels, T = input_features.shape
    assert T % 2 == 0
    x = jnp.transpose(input_features, (0, 2, 1)).astype(jnp.bfloat16)   # (B, T, n_mels)
    h = conv1d_k3_s1_gelu(x, params["conv1_w"], params["conv1_b"])       # (B, T, D)
    D = h.shape[-1]
    Tp = T // 2
    pos = sinusoids(Tp, D)
    h = conv1d_k3_s2_gelu_pos(h, params["conv2_w"], params["conv2_b"], pos)  # (B, Tp, D)
    x2 = h.reshape(B * Tp, D)
    for layer in params["layers"]:
        x2 = encoder_layer(layer, x2, B, Tp)
    out = layernorm(x2, params["ln_f_g"], params["ln_f_b"], out_dtype=jnp.float32)
    return out.reshape(B, Tp, D)


# ----------------------------------------------------------------------------
# Deterministic parameter init (synthetic — no checkpoint load).
# Weights stored bf16 in compute layouts; biases / LN params in f32.
# ----------------------------------------------------------------------------
def init_params(key, n_mels, d_model, n_heads, ffn, n_layers):
    keys = iter(jax.random.split(key, 2 + 6 * n_layers))

    def nrm(shape):
        return (0.02 * jax.random.normal(next(keys), shape, jnp.float32)).astype(jnp.bfloat16)

    zeros = lambda n: jnp.zeros((n,), jnp.float32)
    ones = lambda n: jnp.ones((n,), jnp.float32)

    params = dict(
        # conv weights stored as (K=3, C_in, C_out)  (PyTorch layout would be (C_out, C_in, 3))
        conv1_w=nrm((3, n_mels, d_model)), conv1_b=zeros(d_model),
        conv2_w=nrm((3, d_model, d_model)), conv2_b=zeros(d_model),
        ln_f_g=ones(d_model), ln_f_b=zeros(d_model),
        layers=[],
    )
    for _ in range(n_layers):
        params["layers"].append(dict(
            n_heads=n_heads,
            ln1_g=ones(d_model), ln1_b=zeros(d_model),
            # q|k|v concatenated along the output dim; k-section bias stays zero
            # (HF Whisper k_proj has bias=False).
            wqkv=jnp.concatenate([nrm((d_model, d_model)) for _ in range(3)], axis=1),
            bqkv=jnp.concatenate([zeros(d_model), zeros(d_model), zeros(d_model)]),
            wo=nrm((d_model, d_model)), bo=zeros(d_model),
            ln2_g=ones(d_model), ln2_b=zeros(d_model),
            w1=nrm((d_model, ffn)), b1=zeros(ffn),
            w2=nrm((ffn, d_model)), b2=zeros(d_model),
        ))
    return params


if __name__ == "__main__":
    # TODO(synk): WhisperProcessor's STFT/log-mel extraction is not implemented;
    # the kernels consume mel `input_features` directly (B, n_mels, frames).
    # Small but lane-friendly demo config (real whisper-base: n_mels=80,
    # d_model=512, heads=8, ffn=2048, frames=3000).
    B, n_mels, T = 2, 80, 64
    d_model, n_heads, ffn, n_layers = 128, 2, 512, 2

    key = jax.random.PRNGKey(0)
    k_feat, k_param = jax.random.split(key)
    input_features = jax.random.normal(k_feat, (B, n_mels, T), dtype=jnp.float32)
    params = init_params(k_param, n_mels, d_model, n_heads, ffn, n_layers)

    out = whisper_encoder_forward(params, input_features)
    out = jax.block_until_ready(out)
    assert out.shape == (B, T // 2, d_model), out.shape
    assert bool(jnp.all(jnp.isfinite(out)))
    print("KERNEL_OK")
</pallas_src>

<mosaic_0001>
module attributes {stable_mosaic.version = 11 : i64} {
  func.func @_conv3_s1_gelu_kernel(%arg0: i32, %arg1: memref<1x66x80xbf16, #tpu.memory_space<vmem>>, %arg2: memref<3x80x128xbf16, #tpu.memory_space<vmem>>, %arg3: memref<1x128xf32, #tpu.memory_space<vmem>>, %arg4: memref<1x64x128xbf16, #tpu.memory_space<vmem>>) attributes {dimension_semantics = [#tpu.dimension_semantics<parallel>], iteration_bounds = array<i64: 2>, scalar_prefetch = 0 : i64, scratch_operands = 0 : i64, tpu.core_type = #tpu.core_type<tc>, window_params = [{transform_indices = @transform_0, window_bounds = array<i64: 1, 66, 80>}, {pipeline_mode = #tpu.pipeline_mode<synchronous>, transform_indices = @transform_1, window_bounds = array<i64: 3, 80, 128>}, {pipeline_mode = #tpu.pipeline_mode<synchronous>, transform_indices = @transform_2, window_bounds = array<i64: 1, 128>}, {transform_indices = @transform_3, window_bounds = array<i64: 1, 64, 128>}]} {
    %c0 = arith.constant 0 : index
    %c0_0 = arith.constant 0 : index
    %c0_1 = arith.constant 0 : index
    %0 = vector.load %arg1[%c0, %c0_0, %c0_1] : memref<1x66x80xbf16, #tpu.memory_space<vmem>>, vector<1x64x80xbf16>
    %1 = vector.shape_cast %0 : vector<1x64x80xbf16> to vector<64x80xbf16>
    %c0_2 = arith.constant 0 : index
    %c0_3 = arith.constant 0 : index
    %c0_4 = arith.constant 0 : index
    %2 = vector.load %arg2[%c0_2, %c0_3, %c0_4] : memref<3x80x128xbf16, #tpu.memory_space<vmem>>, vector<1x80x128xbf16>
    %3 = vector.shape_cast %2 : vector<1x80x128xbf16> to vector<80x128xbf16>
    %cst = arith.constant dense<0.000000e+00> : vector<64x128xf32>
    %4 = tpu.matmul %1, %3, %cst {dimension_numbers = #tpu.dot_dimension_numbers<[1], [0], [0], [1], [0, 0, 1, 1], [], []>} : vector<64x80xbf16>, vector<80x128xbf16>, vector<64x128xf32> -> vector<64x128xf32>
    %c0_5 = arith.constant 0 : index
    %c1 = arith.constant 1 : index
    %c0_6 = arith.constant 0 : index
    %5 = vector.load %arg1[%c0_5, %c1, %c0_6] : memref<1x66x80xbf16, #tpu.memory_space<vmem>>, vector<1x64x80xbf16>
    %6 = vector.shape_cast %5 : vector<1x64x80xbf16> to vector<64x80xbf16>
    %c1_7 = arith.constant 1 : index
    %c0_8 = arith.constant 0 : index
    %c0_9 = arith.constant 0 : index
    %7 = vector.load %arg2[%c1_7, %c0_8, %c0_9] : memref<3x80x128xbf16, #tpu.memory_space<vmem>>, vector<1x80x128xbf16>
    %8 = vector.shape_cast %7 : vector<1x80x128xbf16> to vector<80x128xbf16>
    %cst_10 = arith.constant dense<0.000000e+00> : vector<64x128xf32>
    %9 = tpu.matmul %6, %8, %cst_10 {dimension_numbers = #tpu.dot_dimension_numbers<[1], [0], [0], [1], [0, 0, 1, 1], [], []>} : vector<64x80xbf16>, vector<80x128xbf16>, vector<64x128xf32> -> vector<64x128xf32>
    %10 = arith.addf %4, %9 : vector<64x128xf32>
    %c0_11 = arith.constant 0 : index
    %c2 = arith.constant 2 : index
    %c0_12 = arith.constant 0 : index
    %11 = vector.load %arg1[%c0_11, %c2, %c0_12] : memref<1x66x80xbf16, #tpu.memory_space<vmem>>, vector<1x64x80xbf16>
    %12 = vector.shape_cast %11 : vector<1x64x80xbf16> to vector<64x80xbf16>
    %c2_13 = arith.constant 2 : index
    %c0_14 = arith.constant 0 : index
    %c0_15 = arith.constant 0 : index
    %13 = vector.load %arg2[%c2_13, %c0_14, %c0_15] : memref<3x80x128xbf16, #tpu.memory_space<vmem>>, vector<1x80x128xbf16>
    %14 = vector.shape_cast %13 : vector<1x80x128xbf16> to vector<80x128xbf16>
    %cst_16 = arith.constant dense<0.000000e+00> : vector<64x128xf32>
    %15 = tpu.matmul %12, %14, %cst_16 {dimension_numbers = #tpu.dot_dimension_numbers<[1], [0], [0], [1], [0, 0, 1, 1], [], []>} : vector<64x80xbf16>, vector<80x128xbf16>, vector<64x128xf32> -> vector<64x128xf32>
    %16 = arith.addf %10, %15 : vector<64x128xf32>
    %c0_17 = arith.constant 0 : index
    %c0_18 = arith.constant 0 : index
    %17 = vector.load %arg3[%c0_17, %c0_18] : memref<1x128xf32, #tpu.memory_space<vmem>>, vector<1x128xf32>
    %18 = vector.broadcast %17 : vector<1x128xf32> to vector<64x128xf32>
    %19 = arith.addf %16, %18 : vector<64x128xf32>
    %cst_19 = arith.constant 5.000000e-01 : f32
    %20 = vector.broadcast %cst_19 : f32 to vector<64x128xf32>
    %21 = arith.mulf %20, %19 : vector<64x128xf32>
    %cst_20 = arith.constant 4.471500e-02 : f32
    %22 = vector.broadcast %cst_20 : f32 to vector<64x128xf32>
    %23 = arith.mulf %22, %19 : vector<64x128xf32>
    %24 = arith.mulf %23, %19 : vector<64x128xf32>
    %25 = arith.mulf %24, %19 : vector<64x128xf32>
    %26 = arith.addf %19, %25 : vector<64x128xf32>
    %cst_21 = arith.constant 0.797884583 : f32
    %27 = vector.broadcast %cst_21 : f32 to vector<64x128xf32>
    %28 = arith.mulf %27, %26 : vector<64x128xf32>
    %29 = math.tanh %28 : vector<64x128xf32>
    %cst_22 = arith.constant 1.000000e+00 : f32
    %30 = vector.broadcast %cst_22 : f32 to vector<64x128xf32>
    %31 = arith.addf %30, %29 : vector<64x128xf32>
    %32 = arith.mulf %21, %31 : vector<64x128xf32>
    %33 = arith.truncf %32 : vector<64x128xf32> to vector<64x128xbf16>
    %c0_23 = arith.constant 0 : index
    %c0_24 = arith.constant 0 : index
    %c0_25 = arith.constant 0 : index
    %34 = vector.load %arg4[%c0_23, %c0_24, %c0_25] : memref<1x64x128xbf16, #tpu.memory_space<vmem>>, vector<1x64x128xbf16>
    %35 = vector.shape_cast %34 : vector<1x64x128xbf16> to vector<64x128xbf16>
    %36 = vector.shape_cast %33 : vector<64x128xbf16> to vector<1x64x128xbf16>
    tpu.vector_store %arg4[%c0_23, %c0_24, %c0_25], %36 {strides = array<i32>} : memref<1x64x128xbf16, #tpu.memory_space<vmem>>, vector<1x64x128xbf16>,
    return
  }
  func.func @transform_0(%arg0: i32) -> (i32, i32, i32) {
    %c0_i32 = arith.constant 0 : i32
    %c0_i32_0 = arith.constant 0 : i32
    %c0_i32_1 = arith.constant 0 : i32
    return %arg0, %c0_i32, %c0_i32_0 : i32, i32, i32
  }
  func.func @transform_1(%arg0: i32) -> (i32, i32, i32) {
    %c0_i32 = arith.constant 0 : i32
    %c0_i32_0 = arith.constant 0 : i32
    %c0_i32_1 = arith.constant 0 : i32
    %c0_i32_2 = arith.constant 0 : i32
    return %c0_i32, %c0_i32_0, %c0_i32_1 : i32, i32, i32
  }
  func.func @transform_2(%arg0: i32) -> (i32, i32) {
    %c0_i32 = arith.constant 0 : i32
    %c0_i32_0 = arith.constant 0 : i32
    %c0_i32_1 = arith.constant 0 : i32
    return %c0_i32, %c0_i32_0 : i32, i32
  }
  func.func @transform_3(%arg0: i32) -> (i32, i32, i32) {
    %c0_i32 = arith.constant 0 : i32
    %c0_i32_0 = arith.constant 0 : i32
    %c0_i32_1 = arith.constant 0 : i32
    return %arg0, %c0_i32, %c0_i32_0 : i32, i32, i32
  }
}

</mosaic_0001>

<bundles_post_ra>
// kernel: tpu_custom_call.1
= control target key start
LH: loop header
LB: loop body
LE: loop exit
PB: predicated region body
PF: predicated region fallthrough
CT: control target
= control target key end

     0   :  { %8 = vsyncpa [#allocation3], 0  ;;  %s1184_s0 = inlined_call_operand.vmem [shape: bf16[2,66,80], index: 0, kind: input, shape index: {}]   ;;  %s1185_s1 = inlined_call_operand.vmem [shape: bf16[3,80,128], index: 1, kind: input, shape index: {}]   ;;  %s1186_s2 = inlined_call_operand.vmem [shape: f32[1,128], index: 2, kind: input, shape index: {}]   ;;  %s1187_s3 = inlined_call_operand.hbm [shape: bf16[2,64,128], index: 3, kind: output, shape index: {}]  }
   0x1   :  { %10 = vsyncpa [#allocation3 + $0x1], 0  ;;  %s995_s12 = smov 0   ;;  %s997_s13 = smov 0  }
   0x2   :  { %s999_s14 = smov 0   ;;  %s1001_s15 = smov 0  }
   0x3 LB: > { %s1016_s16 = sadd.s32 4294967295, %s971_s15   ;;  %s681_s17 = sadd.s32 4294967294, %s971_s15   ;;  %s971_s15 = sphi %s1001_s15, %s1193_s15   ;;  %s967_s14 = sphi %s999_s14, %s1192_s14   ;;  %s963_s13 = sphi %s997_s13, %s1191_s13   ;;  %s959_s12 = sphi %s995_s12, %s1190_s12  }
   0x4   : > { %s1020_s18 = sadd.s32 1, %s971_s15   ;;  %s91_s19 = sadd.s32 1, %s967_s14 }
   0x5   : > { %s88_s20 = ssub.s32 %s971_s15, %s1020_s18  ;;  %p101_p0 = scmp.ne.s32.totalorder %s967_s14, %s963_s13 }
   0x6   : > { %p89_p1 = scmp.eq.s32.totalorder %s88_s20, 0  ;;  %p102_p2 = scmp.eq.s32.totalorder %s1016_s16, 1 }
   0x7   : > { %p107_p3 = scmp.ne.s32.totalorder %s963_s13, %s959_s12  ;;  %p108_p4 = scmp.eq.s32.totalorder %s681_s17, 1 }
   0x8   : > { %s1031_s21 = scalar_select %p89_p1, %s967_s14, %s91_s19  }
   0x9   : > { %p1033_p5 = por %p102_p2, %p101_p0  ;;  %p1037_p6 = por %p108_p4, %p107_p3 }
   0xa   : > { %p684_p7 = scmp.ge.s32.totalorder %s971_s15, 1  ;;  %p140_p8 = scmp.lt.s32.totalorder %s971_s15, 3 }
   0xc   : > { %p141_p9 = pnand %p684_p7, %p140_p8 }
   0xd   : > { %p164_p10 = scmp.lt.s32.totalorder (!%p141_p9), %s1016_s16, 1  ;;  %s161_s25 = sand.u32 (!%p141_p9), 1, %s963_s13  }
   0xe   : > { %144 = sbr.rel (%p141_p9) target bundleno = 259 (0x103), region = 32  ;;  %s814_s28 = sshll.u32 (!%p141_p9), %s1016_s16, 5 }
   0xf   : > { %s615_s4 = scalar_lea.hbm (!%p141_p9), %s1187_s3, %s814_s28  ;;  %s929_s11 = scalar_lea.hbm (!%p141_p9), %s1187_s3, 64 }
  0x10   : > { %s618_s6 = sshll.u32 (!%p141_p9), %s615_s4, 4  ;;  %s619_s6 = int_to_ptr.hbm [resolvable:$true] %s618_s6 }
  0x13   : > { %v808_v0 = vld [vmem:[%s1185_s1 + $0x48] sm:$0xff]  ;;  %v803_v1 = vld [vmem:[%s1185_s1 + $0x20] sm:$0xff]  ;;  %v813_v2 = vld [vmem:[%s1185_s1 + $0x70] sm:$0xff]  ;;  %s165_s7 = scalar_select %p164_p10, %s1016_s16, 1  ;;  %vm223_vm0 = vsmask.f32 7424 }
  0x14   : > { %306 = vmatpush.bf16.msra.mxu0 %v808_v0  ;;  %373 = vmatpush.bf16.msra.mxu1 %v803_v1  ;;  %v807_v3 = vld [vmem:[%s1185_s1 + $0x40] sm:$0xff]  ;;  %v802_v4 = vld [vmem:[%s1185_s1 + $0x18] sm:$0xff]  ;;  %v812_v5 = vld [vmem:[%s1185_s1 + $0x68] sm:$0xff]  ;;  %vm414_vm1 = vcmask 1046528   ;;  %vm290_vm2 = vcmask 654336   ;;  %s604_s16 = scalar_lea.sflag [#allocation3], %s161_s25 }
  0x15   : > { %469 = vmatpush.bf16.msra.mxu2 %v813_v2  ;;  %845 = vmatpush.bf16.msra.mxu3 %v808_v0  ;;  %s850_s10 = smul.u32 36, %s165_s7  ;;  %v806_v6 = vld [vmem:[%s1185_s1 + $0x38] sm:$0xff]  ;;  %v801_v7 = vld [vmem:[%s1185_s1 + $0x10] sm:$0xff]  ;;  %v811_v8 = vld [vmem:[%s1185_s1 + $0x60] sm:$0xff]  ;;  %s923_s7 = sshra.s32 %s619_s6, 4  ;;  %s924_s7 = int_to_ptr.hbm [resolvable:$true] %s923_s7 }
  0x16   : > { %v805_v16 = vld [vmem:[%s1185_s1 + $0x30] sm:$0xff]  ;;  %v800_v17 = vld [vmem:[%s1185_s1 + $0x8] sm:$0xff]  ;;  %v810_v20 = vld [vmem:[%s1185_s1 + $0x58] sm:$0xff]  ;;  %s925_s8 = scalar_lea.hbm %s924_s7, 32  ;;  %p930_p0 = scmp.lt.s32.totalorder %s924_s7, %s1187_s3 }
  0x17   : > { %s1072_s26 = scalar_lea.vmem %s1184_s0, %s850_s10  ;;  %v804_v25 = vld [vmem:[%s1185_s1 + $0x28] sm:$0xff]  ;;  %v799_v26 = vld [vmem:[%s1185_s1] sm:$0xff]  ;;  %v809_v28 = vld [vmem:[%s1185_s1 + $0x50] sm:$0xff]  ;;  %p926_p11 = scmp.ne.s32.totalorder %s924_s7, %s925_s8 }
  0x18   : > { %307 = vmatpush.bf16.msra.mxu0 %v807_v3  ;;  %374 = vmatpush.bf16.msra.mxu1 %v802_v4  ;;  %v816_v9 = vld [vmem:[%s1072_s26] sm:$0xff]   ;;  %v796_v10 = vld [vmem:[%s1072_s26 + $0x8] sm:$0xff]  ;;  %v1082_v14 = vld [vmem:[%s1072_s26 + $0x10] sm:$0xff]  ;;  %p931_p1 = scmp.lt.s32.totalorder %s929_s11, %s925_s8 }
  0x19   : > { %470 = vmatpush.bf16.msra.mxu2 %v812_v5  ;;  %846 = vmatpush.bf16.msra.mxu3 %v807_v3  ;;  %v227_v11 = vshll.u32 %v816_v9, 16  ;;  %v839_v12 = vld [vmem:[%s1072_s26] sm:$0xf0]  ;;  %v840_v13 = vld [vmem:[%s1072_s26] sm:$0xe]  ;;  %v232_v15 = vshll.u32 %v796_v10, 16  ;;  %p927_p12 = pnand %p926_p11, %p1033_p5 }
  0x1a   : > { %v225_v18 = vshrl.u32 %v816_v9, 16  ;;  %v841_v21 = vor.u32 %v840_v13, %v839_v12  ;;  %v236_v22 = vshrl.u32 %v796_v10, 16  ;;  %v240_v23 = vshll.u32 %v1082_v14, 16  ;;  %v798_v36 = vld [vmem:[%s1072_s26 + $0x18] sm:$0xff]  ;;  %v188_v42 = vld [vmem:[%s1072_s26 + $0x20] sm:$0x1]  ;;  %p932_p2 = por %p931_p1, %p930_p0 }
  0x1b   : > { %v229_v19 = vrot.slane %v227_v11, 1  ;;  %v234_v24 = vrot.slane %v232_v15, 1  ;;  %v416_v30 = vrot.slane %v796_v10, 1  ;;  %v244_v37 = vshrl.u32 %v1082_v14, 16  ;;  %v1131_v59 = vld [vmem:[%s1186_s2] ss:$0 sm:$0xff]  ;;  %p928_p13 = pneg %p927_p12 }
  0x1c   : > { %308 = vmatpush.bf16.msra.mxu0 %v806_v6  ;;  %375 = vmatpush.bf16.msra.mxu1 %v801_v7  ;;  %v415_v29 = vrot.slane %v841_v21, 1  ;;  %v242_v32 = vrot.slane %v240_v23, 1  ;;  %v248_v38 = vshll.u32 %v798_v36, 16  ;;  %v418_v39 = vrot.slane %v1082_v14, 1  ;;  %s685_s26 = sshll.u32 %s161_s25, 5 }
  0x1d   : > { %471 = vmatpush.bf16.msra.mxu2 %v811_v8  ;;  %847 = vmatpush.bf16.msra.mxu3 %v806_v6  ;;  %v230_v27 = vor.u32 %v229_v19, %v225_v18  ;;  %v238_v31 = vor.u32 %v236_v22, %v234_v24  ;;  %v217_v45 = vunpack.c.l.b16 %v188_v42  ;;  %v252_v47 = vshrl.u32 %v798_v36, 16  ;;  %s1141_s27 = scalar_lea.vmem [#allocation2], %s685_s26  ;;  %p933_p3 = pnand %p932_p2, %p928_p13 }
  0x1e   : > { %v417_v34 = vsel %vm414_vm1, %v415_v29, %v416_v30  ;;  %v246_v40 = vor.u32 %v244_v37, %v242_v32  ;;  %v250_v41 = vrot.slane %v248_v38, 1  ;;  %v419_v43 = vsel %vm414_vm1, %v416_v30, %v418_v39  ;;  %s616_s5 = sshll.u32 %s1141_s27, 4  ;;  %s617_s5 = int_to_ptr.vmem [resolvable:$true] %s616_s5 }
  0x1f   : > { %v235_v33 = vsel %vm223_vm0, %v230_v27, %v234_v24  ;;  %v243_v35 = vsel %vm223_vm0, %v238_v31, %v242_v32  ;;  %v222_v46 = vpack.c.b16 %v217_v45, %v217_v45  ;;  %v420_v49 = vrot.slane %v798_v36, 1 }
  0x20   : > { %309 = vmatpush.bf16.msra.mxu0 %v805_v16  ;;  %376 = vmatpush.bf16.msra.mxu1 %v800_v17  ;;  %v251_v44 = vsel %vm223_vm0, %v246_v40, %v250_v41  ;;  %v254_v50 = vor.u32 %v252_v47, %v250_v41 }
  0x21   : > { %472 = vmatpush.bf16.msra.mxu2 %v810_v20  ;;  %848 = vmatpush.bf16.msra.mxu3 %v805_v16  ;;  %v256_v48 = vshll.u32 %v222_v46, 16  ;;  %v421_v52 = vsel %vm414_vm1, %v418_v39, %v420_v49  ;;  %v422_v54 = vrot.slane %v222_v46, 1 }
  0x23   : > { %v258_v51 = vrot.slane %v256_v48, 1  ;;  %v423_v55 = vsel %vm414_vm1, %v420_v49, %v422_v54 }
  0x24   : > { %310 = vmatpush.bf16.msra.mxu0 %v804_v25  ;;  %377 = vmatpush.bf16.msra.mxu1 %v799_v26 }
  0x25   : > { %473 = vmatpush.bf16.msra.mxu2 %v809_v28  ;;  %849 = vmatpush.bf16.msra.mxu3 %v804_v25  ;;  %v259_v53 = vsel %vm223_vm0, %v254_v50, %v258_v51 }
  0x27   : > { %729 = vmatmul.msk.bf16.vlgmr.msra.gmra.mxu0 %vm290_vm2, %v235_v33  ;;  %753 = vmatmul.msk.bf16.vlgmr.msra.gmra.mxu1 %vm290_vm2, %v816_v9 }
  0x28   : > { %787 = vmatmul.msk.bf16.vlgmr.msra.gmra.mxu2 %vm290_vm2, %v417_v34  ;;  %730 = vmatmul.msk.bf16.vlgmr.msra.gmra.mxu3 %vm290_vm2, %v243_v35 }
  0x37   : > { %754 = vmatmul.msk.bf16.gmra.mxu1 %vm290_vm2, %v796_v10 }
  0x38   : > { %788 = vmatmul.msk.bf16.gmra.mxu2 %vm290_vm2, %v419_v43  ;;  %731 = vmatmul.msk.bf16.gmra.mxu3 %vm290_vm2, %v251_v44 }
  0x47   : > { %755 = vmatmul.msk.bf16.gmra.mxu1 %vm290_vm2, %v1082_v14 }
  0x48   : > { %789 = vmatmul.msk.bf16.gmra.mxu2 %vm290_vm2, %v421_v52  ;;  %732 = vmatmul.msk.bf16.gmra.mxu3 %vm290_vm2, %v259_v53 }
  0x57   : > { %756 = vmatmul.msk.bf16.gmra.mxu1 %vm290_vm2, %v798_v36 }
  0x58   : > { %790 = vmatmul.msk.bf16.gmra.mxu2 %vm290_vm2, %v423_v55 }
  0xa4   : > { %v379_v56 = vpop.f32.mrf.mxu1  ;;  %v312_v57 = vpop.f32.mrf.mxu0 }
  0xa5   : > { %v380_v58 = vadd.f32 %v379_v56, %v312_v57 }
  0xab   : > { %v475_v60 = vpop.f32.mrf.mxu2  ;;  %v317_v1 = vpop.f32.mrf.mxu3 }
  0xac   : > { %v495_v61 = vadd.f32 %v475_v60, %v380_v58  ;;  %v381_v62 = vpop.f32.mrf.mxu1  ;;  %v314_v0 = vpop.f32.mrf.mxu0 }
  0xad   : > { %v382_v4 = vadd.f32 %v381_v62, %v314_v0 }
  0xae   : > { %v507_v63 = vadd.f32 %v1131_v59, %v495_v61 }
  0xb0   : > { %v523_v2 = vmul.f32 0.044715, %v507_v63  ;;  %v515_v38 = vmul.f32 0.5, %v507_v63 }
  0xb2   : > { %v531_v3 = vmul.f32 %v523_v2, %v507_v63 }
  0xb3   : > { %v477_v5 = vpop.f32.mrf.mxu2  ;;  %v319_v13 = vpop.f32.mrf.mxu3 }
  0xb4   : > { %v539_v6 = vmul.f32 %v531_v3, %v507_v63  ;;  %v496_v7 = vadd.f32 %v477_v5, %v382_v4  ;;  %v384_v8 = vpop.f32.mrf.mxu1 }
  0xb5   : > { %v385_v12 = vadd.f32 %v384_v8, %v317_v1 }
  0xb6   : > { %v547_v9 = vadd.f32 %v539_v6, %v507_v63  ;;  %v508_v10 = vadd.f32 %v1131_v59, %v496_v7 }
  0xb8   : > { %v524_v11 = vmul.f32 0.044715, %v508_v10  ;;  %v555_v14 = vmul.f32 0.7978846, %v547_v9  ;;  %v516_v39 = vmul.f32 0.5, %v508_v10 }
  0xba   : > { %v532_v15 = vmul.f32 %v524_v11, %v508_v10  ;;  %893 = vtanh.f32 %v555_v14 }
  0xbb   : > { %v480_v16 = vpop.f32.mrf.mxu2  ;;  %v322_v26 = vpop.f32.mrf.mxu3 }
  0xbc   : > { %v540_v17 = vmul.f32 %v532_v15, %v508_v10  ;;  %v497_v18 = vadd.f32 %v480_v16, %v385_v12  ;;  %v386_v19 = vpop.f32.mrf.mxu1 }
  0xbd   : > { %v387_v25 = vadd.f32 %v386_v19, %v319_v13 }
  0xbe   : > { %v548_v20 = vadd.f32 %v540_v17, %v508_v10  ;;  %v509_v21 = vadd.f32 %v1131_v59, %v497_v18 }
  0xc0   : > { %v556_v22 = vmul.f32 0.7978846, %v548_v20  ;;  %v525_v23 = vmul.f32 0.044715, %v509_v21  ;;  %v894_v28 = vpop.eup %893  ;;  %v517_v6 = vmul.f32 0.5, %v509_v21 }
  0xc1   : > { %v571_v34 = vadd.f32 1.0, %v894_v28 }
  0xc2   : > { %895 = vtanh.f32 %v556_v22  ;;  %v533_v24 = vmul.f32 %v525_v23, %v509_v21 }
  0xc3   : > { %v482_v27 = vpop.f32.mrf.mxu2  ;;  %v579_v43 = vmul.f32 %v571_v34, %v515_v38  ;;  %v324_v50 = vpop.f32.mrf.mxu3 }
  0xc4   : > { %v541_v29 = vmul.f32 %v533_v24, %v509_v21  ;;  %v498_v30 = vadd.f32 %v482_v27, %v387_v25  ;;  %v389_v31 = vpop.f32.mrf.mxu1 }
  0xc5   : > { %v390_v37 = vadd.f32 %v389_v31, %v322_v26 }
  0xc6   : > { %v549_v32 = vadd.f32 %v541_v29, %v509_v21  ;;  %v510_v33 = vadd.f32 %v1131_v59, %v498_v30 }
  0xc8   : > { %v896_v35 = vpop.eup %895  ;;  %v526_v36 = vmul.f32 0.044715, %v510_v33  ;;  %v557_v41 = vmul.f32 0.7978846, %v549_v32  ;;  %v518_v7 = vmul.f32 0.5, %v510_v33 }
  0xc9   : > { %v572_v40 = vadd.f32 1.0, %v896_v35 }
  0xca   : > { %v534_v42 = vmul.f32 %v526_v36, %v510_v33  ;;  %897 = vtanh.f32 %v557_v41 }
  0xcb   : > { %v580_v44 = vmul.f32 %v572_v40, %v516_v39  ;;  %v485_v45 = vpop.f32.mrf.mxu2  ;;  %v327_v2 = vpop.f32.mrf.mxu3 }
  0xcc   : > { %v542_v46 = vmul.f32 %v534_v42, %v510_v33  ;;  %v499_v47 = vadd.f32 %v485_v45, %v390_v37  ;;  %v391_v48 = vpop.f32.mrf.mxu1 }
  0xcd   : > { %v822_v49 = vpack.c.bf16 %v580_v44, %v579_v43  ;;  %v392_v56 = vadd.f32 %v391_v48, %v324_v50 }
  0xce   : > { %v550_v51 = vadd.f32 %v542_v46, %v510_v33  ;;  %v511_v52 = vadd.f32 %v1131_v59, %v499_v47 }
  0xcf   : > { %823 = vst [vmem:[%s1141_s27] sm:$0xff] %v822_v49  }
  0xd0   : > { %v558_v53 = vmul.f32 0.7978846, %v550_v51  ;;  %v527_v54 = vmul.f32 0.044715, %v511_v52  ;;  %v898_v58 = vpop.eup %897  ;;  %v519_v34 = vmul.f32 0.5, %v511_v52 }
  0xd1   : > { %v573_v1 = vadd.f32 1.0, %v898_v58 }
  0xd2   : > { %899 = vtanh.f32 %v558_v53  ;;  %v535_v55 = vmul.f32 %v527_v54, %v511_v52 }
  0xd3   : > { %v487_v57 = vpop.f32.mrf.mxu2  ;;  %v581_v11 = vmul.f32 %v573_v1, %v517_v6  ;;  %v329_v23 = vpop.f32.mrf.mxu3 }
  0xd4   : > { %v543_v60 = vmul.f32 %v535_v55, %v511_v52  ;;  %v500_v61 = vadd.f32 %v487_v57, %v392_v56  ;;  %v394_v62 = vpop.f32.mrf.mxu1 }
  0xd5   : > { %v395_v5 = vadd.f32 %v394_v62, %v327_v2 }
  0xd6   : > { %v551_v63 = vadd.f32 %v543_v60, %v511_v52  ;;  %v512_v0 = vadd.f32 %v1131_v59, %v500_v61 }
  0xd8   : > { %v900_v3 = vpop.eup %899  ;;  %v528_v4 = vmul.f32 0.044715, %v512_v0  ;;  %v559_v9 = vmul.f32 0.7978846, %v551_v63  ;;  %v520_v35 = vmul.f32 0.5, %v512_v0 }
  0xd9   : > { %v574_v8 = vadd.f32 1.0, %v900_v3 }
  0xda   : > { %v536_v10 = vmul.f32 %v528_v4, %v512_v0  ;;  %901 = vtanh.f32 %v559_v9 }
  0xdb   : > { %v582_v12 = vmul.f32 %v574_v8, %v518_v7  ;;  %v490_v13 = vpop.f32.mrf.mxu2 }
  0xdc   : > { %v544_v14 = vmul.f32 %v536_v10, %v512_v0  ;;  %v501_v15 = vadd.f32 %v490_v13, %v395_v5  ;;  %v396_v19 = vpop.f32.mrf.mxu1 }
  0xdd   : > { %v827_v16 = vpack.c.bf16 %v582_v12, %v581_v11  ;;  %v397_v24 = vadd.f32 %v396_v19, %v329_v23 }
  0xde   : > { %v552_v17 = vadd.f32 %v544_v14, %v512_v0  ;;  %v513_v18 = vadd.f32 %v1131_v59, %v501_v15 }
  0xdf   : > { %842 = vst [vmem:[%s1141_s27 + $0x8] sm:$0xff] %v827_v16  }
  0xe0   : > { %v560_v20 = vmul.f32 0.7978846, %v552_v17  ;;  %v529_v22 = vmul.f32 0.044715, %v513_v18  ;;  %v902_v26 = vpop.eup %901  ;;  %v521_v47 = vmul.f32 0.5, %v513_v18 }
  0xe1   : > { %v575_v31 = vadd.f32 1.0, %v902_v26 }
  0xe2   : > { %903 = vtanh.f32 %v560_v20  ;;  %v537_v21 = vmul.f32 %v529_v22, %v513_v18 }
  0xe3   : > { %v492_v25 = vpop.f32.mrf.mxu2  ;;  %v583_v39 = vmul.f32 %v575_v31, %v519_v34 }
  0xe4   : > { %v545_v27 = vmul.f32 %v537_v21, %v513_v18  ;;  %v502_v28 = vadd.f32 %v492_v25, %v397_v24 }
  0xe6   : > { %v553_v29 = vadd.f32 %v545_v27, %v513_v18  ;;  %v514_v30 = vadd.f32 %v1131_v59, %v502_v28 }
  0xe8   : > { %v904_v32 = vpop.eup %903  ;;  %v530_v33 = vmul.f32 0.044715, %v514_v30  ;;  %v561_v37 = vmul.f32 0.7978846, %v553_v29  ;;  %v522_v48 = vmul.f32 0.5, %v514_v30 }
  0xe9   : > { %v576_v36 = vadd.f32 1.0, %v904_v32 }
  0xea   : > { %v538_v38 = vmul.f32 %v530_v33, %v514_v30  ;;  %905 = vtanh.f32 %v561_v37 }
  0xeb   : > { %v584_v40 = vmul.f32 %v576_v36, %v520_v35 }
  0xec   : > { %v546_v41 = vmul.f32 %v538_v38, %v514_v30 }
  0xed   : > { %v832_v42 = vpack.c.bf16 %v584_v40, %v583_v39 }
  0xee   : > { %v554_v43 = vadd.f32 %v546_v41, %v514_v30 }
  0xef   : > { %843 = vst [vmem:[%s1141_s27 + $0x10] sm:$0xff] %v832_v42  }
  0xf0   : > { %v562_v44 = vmul.f32 0.7978846, %v554_v43  ;;  %v906_v59 = vpop.eup %905 }
  0xf1   : > { %v577_v45 = vadd.f32 1.0, %v906_v59 }
  0xf2   : > { %907 = vtanh.f32 %v562_v44 }
  0xf3   : > { %v585_v50 = vmul.f32 %v577_v45, %v521_v47 }
  0xf8   : > { %v908_v46 = vpop.eup %907 }
  0xf9   : > { %v578_v49 = vadd.f32 1.0, %v908_v46 }
  0xfb   : > { %v586_v51 = vmul.f32 %v578_v49, %v522_v48 }
  0xfd   : > { %v837_v52 = vpack.c.bf16 %v586_v51, %v585_v50 }
  0xff   : > { %844 = vst [vmem:[%s1141_s27 + $0x18] sm:$0xff] %v837_v52  }
 0x100   : > { %936 = shalt.err (!%p933_p3)
}
 0x101   : > { %s973_s20 = smov 64   ;;  %s974_s24 = smov 4  }
 0x102   : > { %851 = dma.vmem_to_hbm [thread:$0]  (%p1033_p5), %s617_s5, 512, %s619_s6, %s604_s16, %s973_s20, %s973_s20, %s974_s24  }
 0x103 PF: > { %p857_p4 = scmp.ge.s32.totalorder %s971_s15, 2  ;;  %s633_s25 = sand.u32 1, %s959_s12  }
 0x104   : > { %s634_s26 = scalar_lea.sflag [#allocation3], %s633_s25 }
 0x105   : > { %p854_p7 = pnand %p857_p4, %p1037_p6 }
 0x107   : > { %p855_p8 = pneg %p854_p7 }
 0x109   : > { %954 = dma.done.wait (%p855_p8), %s634_s26, 512  }
 0x10a   : > { %956 = vsyncadd (%p855_p8), %s634_s26, 4294966784  ;;  %p13_p9 = scmp.ge.s32.totalorder %s1020_s18, 4   ;;  %s1190_s12 = smov %s963_s13 }
 0x10b   : > { %s1191_s13 = smov %s967_s14  ;;  %s1192_s14 = smov %s1031_s21 }
 0x10c   : > { %s1193_s15 = smov %s1020_s18  ;;  %15 = sbr.rel (!%p13_p9) target bundleno = 3 (0x3), region = 69 }
 0x111   :  { %640 = vsyncpa [#allocation3], 1 }
 0x112   :  { %642 = vsyncpa [#allocation3 + $0x1], 1 }

</bundles_post_ra>
